<compile_context>
chip_gen: v7x
topology: tpu7x:2x2x1
jax: 0.10.0
libtpu: 0.0.40
codegen_flags: <defaults>
</compile_context>

<pallas_src>
import functools

import jax
import jax.numpy as jnp
from jax.experimental import pallas as pl
from jax.experimental.pallas import tpu as pltpu

_LANE = 128
_SUBLANE = 8
_MAX_TM = 2048


def _round_up(x, m):
    return ((x + m - 1) // m) * m


def _cdiv(a, b):
    return (a + b - 1) // b


def _vmem_budgets():
    """Generation-aware (tile_budget, vmem_limit) in bytes."""
    try:
        cap = int(pltpu.get_tpu_info().vmem_capacity_bytes)
    except Exception:
        cap = 64 * 1024 * 1024          # conservative fallback (v7x-sized)
    if cap <= 0:
        cap = 64 * 1024 * 1024
    vmem_limit = min(int(cap * 0.85), 110 * 1024 * 1024)
    tile_budget = min(int(cap * 0.45), 56 * 1024 * 1024)
    return tile_budget, vmem_limit


def _largest_k_tile(k, cap):
    """Largest multiple of 128 <= cap dividing k; else largest multiple of 128 <= cap."""
    cap = max(int(cap), _LANE)
    best = 0
    t = _LANE
    limit = min(cap, k)
    while t <= limit:
        if k % t == 0:
            best = t
        t += _LANE
    if best:
        return best
    return max(_LANE, (cap // _LANE) * _LANE)


# ---------------------------------------------------------------------------
# Kernels
# ---------------------------------------------------------------------------
def _matmul_kernel(x_ref, p_ref, o_ref, *, cast_to=None):
    """Single K tile: one MXU dot per (tm, tn) output tile, no accumulator."""
    x = x_ref[...]
    p = p_ref[...]
    if cast_to is not None:                    # in-kernel VPU cast (hidden under DMA/MXU)
        x = x.astype(cast_to)
        p = p.astype(cast_to)
    o_ref[...] = jnp.dot(x, p, preferred_element_type=jnp.float32).astype(o_ref.dtype)


def _matmul_k_acc_out_kernel(x_ref, p_ref, o_ref, *, cast_to=None):
    """K-tiled, f32 output: accumulate directly into the resident output block."""
    @pl.when(pl.program_id(2) == 0)
    def _():
        o_ref[...] = jnp.zeros_like(o_ref)

    x = x_ref[...]
    p = p_ref[...]
    if cast_to is not None:
        x = x.astype(cast_to)
        p = p.astype(cast_to)
    o_ref[...] += jnp.dot(x, p, preferred_element_type=jnp.float32)


def _matmul_k_scratch_kernel(x_ref, p_ref, o_ref, acc_ref, *, cast_to=None):
    """K-tiled, non-f32 output: f32 scratch accumulator, cast on the last step."""
    k = pl.program_id(2)

    @pl.when(k == 0)
    def _():
        acc_ref[...] = jnp.zeros_like(acc_ref)

    x = x_ref[...]
    p = p_ref[...]
    if cast_to is not None:
        x = x.astype(cast_to)
        p = p.astype(cast_to)
    acc_ref[...] += jnp.dot(x, p, preferred_element_type=jnp.float32)

    @pl.when(k == pl.num_programs(2) - 1)
    def _():
        o_ref[...] = acc_ref[...].astype(o_ref.dtype)


# ---------------------------------------------------------------------------
# Wrapper
# ---------------------------------------------------------------------------
@functools.partial(jax.jit, static_argnames=("tm", "tn", "tk", "compute_dtype"))
def prototype_matrix_forward(x, prototypes, *, tm=None, tn=None, tk=None,
                             compute_dtype=None):
    """Compute torch.matmul(x, prototypes) with a Pallas TPU kernel.

    x           : [..., in_features]
    prototypes  : [in_features, num_classes]
    returns     : [..., num_classes]

    compute_dtype=jnp.bfloat16 casts operands in-kernel (f32 accumulation) for
    MXU peak on v5e/v6e/v7x; default None keeps exact f32 semantics.
    """
    K2, N = prototypes.shape

    # torch.matmul broadcasting over leading dims of x -> flatten to 2-D.
    orig_shape = x.shape
    x2 = x[None, :] if x.ndim == 1 else x.reshape(-1, x.shape[-1])
    M, K = x2.shape
    assert K == K2, "in_features mismatch"

    out_dtype = jnp.result_type(x.dtype, prototypes.dtype)
    x_bytes = jnp.dtype(x.dtype).itemsize
    p_bytes = jnp.dtype(prototypes.dtype).itemsize
    o_bytes = jnp.dtype(out_dtype).itemsize

    tile_budget, vmem_limit = _vmem_budgets()

    # ---- N tiling: keep the prototypes fully resident whenever they fit ----
    if tn is not None:
        tn = N if tn >= N else max(_LANE, (int(tn) // _LANE) * _LANE)
    elif N <= 512 or 2 * K * N * p_bytes <= tile_budget // 2:
        tn = N            # single tile; constant block index along M -> no re-stream
    else:
        tn = 512          # stream prototypes in lane-dense 512-wide column tiles

    # ---- K tiling: single tile (no accumulator) whenever the budget allows --
    m_rows = max(_SUBLANE, _round_up(M, _SUBLANE))
    if tk is not None:
        tk = K if tk >= K else max(_LANE, (int(tk) // _LANE) * _LANE)
    else:
        tm_target = min(512, m_rows)
        fixed = 2 * tm_target * tn * o_bytes + tm_target * tn * 4
        per_k = 2 * (tm_target * x_bytes + tn * p_bytes)
        tk_cap = max(_LANE, (tile_budget - fixed) // per_k)
        tk = K if K <= tk_cap else _largest_k_tile(K, tk_cap)

    k_pad = _round_up(K, tk)
    grid_k = k_pad // tk
    needs_scratch = grid_k > 1 and jnp.dtype(out_dtype) != jnp.dtype(jnp.float32)

    # ---- M tiling: fill the remaining VMEM budget with x rows ----------------
    if tm is not None:
        tm = max(_SUBLANE, min(_round_up(int(tm), _SUBLANE), m_rows))
    else:
        proto_tile = 2 * tk * tn * p_bytes
        per_row = 2 * tk * x_bytes + 2 * tn * o_bytes + (tn * 4 if needs_scratch else 0)
        tm = max(_SUBLANE, min((tile_budget - proto_tile) // per_row, _MAX_TM, m_rows))
        tm = (tm // 256) * 256 if tm >= 512 else (tm // _SUBLANE) * _SUBLANE
        tm = max(tm, _SUBLANE)
        # v7x shards "parallel" grid axes over 2 TensorCores: make sure a
        # single-tile problem still produces >= 2 parallel grid steps.
        if _cdiv(M, tm) * _cdiv(N, tn) == 1 and M > _SUBLANE:
            tm = _round_up(_cdiv(M, 2), _SUBLANE)

    grid_m = _cdiv(M, tm)
    grid_n = _cdiv(N, tn)

    # ---- only the reduction dim ever needs (zero) padding --------------------
    if k_pad != K:
        xp = jnp.pad(x2, ((0, 0), (0, k_pad - K)))
        pp = jnp.pad(prototypes, ((0, k_pad - K), (0, 0)))
    else:
        xp, pp = x2, prototypes

    # In-kernel cast target (optional bf16 compute, or mixed-dtype promotion).
    if compute_dtype is not None:
        cast_to = jnp.dtype(compute_dtype)
    elif x.dtype != prototypes.dtype:
        cast_to = jnp.dtype(out_dtype)
    else:
        cast_to = None

    # ---- grid / specs ---------------------------------------------------------
    if grid_k == 1:
        kernel = functools.partial(_matmul_kernel, cast_to=cast_to)
        scratch = []
        dims = ("parallel", "parallel")
        # If both operands are tiled and the prototypes are the bigger stream,
        # iterate M innermost so the prototype tile is the one held resident.
        swap_mn = False
        if grid_m > 1 and grid_n > 1:
            x_total = M * k_pad * x_bytes
            p_total = k_pad * N * p_bytes
            swap_mn = (p_total + x_total * grid_n) < (x_total + p_total * grid_m)
        if swap_mn:
            grid = (grid_n, grid_m)
            in_specs = [pl.BlockSpec((tm, tk), lambda j, i: (i, 0)),
                        pl.BlockSpec((tk, tn), lambda j, i: (0, j))]
            out_spec = pl.BlockSpec((tm, tn), lambda j, i: (i, j))
        else:
            grid = (grid_m, grid_n)
            in_specs = [pl.BlockSpec((tm, tk), lambda i, j: (i, 0)),
                        pl.BlockSpec((tk, tn), lambda i, j: (0, j))]
            out_spec = pl.BlockSpec((tm, tn), lambda i, j: (i, j))
    else:
        dims = ("parallel", "parallel", "arbitrary")
        grid = (grid_m, grid_n, grid_k)
        in_specs = [pl.BlockSpec((tm, tk), lambda i, j, k: (i, k)),
                    pl.BlockSpec((tk, tn), lambda i, j, k: (k, j))]
        out_spec = pl.BlockSpec((tm, tn), lambda i, j, k: (i, j))
        if needs_scratch:
            kernel = functools.partial(_matmul_k_scratch_kernel, cast_to=cast_to)
            scratch = [pltpu.VMEM((tm, tn), jnp.float32)]
        else:
            kernel = functools.partial(_matmul_k_acc_out_kernel, cast_to=cast_to)
            scratch = []

    cost = pl.CostEstimate(
        flops=2 * M * N * k_pad,
        transcendentals=0,
        bytes_accessed=M * k_pad * x_bytes + k_pad * N * p_bytes + M * N * o_bytes,
    )
    cparams = pltpu.CompilerParams(
        dimension_semantics=dims,
        vmem_limit_bytes=vmem_limit,
    )

    out = pl.pallas_call(
        kernel,
        out_shape=jax.ShapeDtypeStruct((M, N), out_dtype),
        grid_spec=pltpu.PrefetchScalarGridSpec(
            num_scalar_prefetch=0,
            grid=grid,
            in_specs=in_specs,
            out_specs=out_spec,
            scratch_shapes=scratch,
        ),
        compiler_params=cparams,
        cost_estimate=cost,
    )(xp, pp)

    if x.ndim == 1:
        return out[0]
    return out.reshape(orig_shape[:-1] + (N,))


# ---------------------------------------------------------------------------
# Demo / correctness checks
# ---------------------------------------------------------------------------
if __name__ == "__main__":
    key = jax.random.PRNGKey(0)
    k1, k2, k3, k4, k5 = jax.random.split(key, 5)

    # 1) Typical PrototypeMatrix head: batch=8, in_features=32, num_classes=16.
    batch, in_features, num_classes = 8, 32, 16
    x = jax.random.normal(k1, (batch, in_features), dtype=jnp.float32)
    # torch.rand -> U[0, 1)
    prototypes = jax.random.uniform(k2, (in_features, num_classes), dtype=jnp.float32)

    out = jax.block_until_ready(prototype_matrix_forward(x, prototypes))
    ref = x @ prototypes
    assert out.shape == (batch, num_classes)
    assert jnp.allclose(out, ref, atol=1e-5, rtol=1e-5), "mismatch vs reference"

    # 2) Leading batch dims + ragged M (exercises partial tail blocks, no padding copies).
    x3 = jax.random.normal(k3, (2, 5, in_features), dtype=jnp.float32)
    out3 = jax.block_until_ready(prototype_matrix_forward(x3, prototypes))
    ref3 = (x3.reshape(-1, in_features) @ prototypes).reshape(2, 5, num_classes)
    assert out3.shape == (2, 5, num_classes)
    assert jnp.allclose(out3, ref3, atol=1e-5, rtol=1e-5), "batched mismatch"

    # 3) K-tiled accumulation path.
    x_big = jax.random.normal(k4, (64, 1024), dtype=jnp.float32)
    p_big = jax.random.uniform(k5, (1024, 256), dtype=jnp.float32)
    out_big = jax.block_until_ready(prototype_matrix_forward(x_big, p_big, tk=256))
    ref_big = x_big @ p_big
    assert jnp.allclose(out_big, ref_big, atol=1e-3, rtol=1e-4), "K-tiled mismatch"

    # 4) Optional bf16 compute path (looser tolerance by design).
    out_bf = jax.block_until_ready(
        prototype_matrix_forward(x, prototypes, compute_dtype=jnp.bfloat16))
    assert jnp.allclose(out_bf, ref, atol=2e-1, rtol=5e-2), "bf16 compute mismatch"

    print("KERNEL_OK")
</pallas_src>

<mosaic_0001>
module attributes {stable_mosaic.version = 11 : i64} {
  func.func @_matmul_kernel(%arg0: i32, %arg1: i32, %arg2: memref<8x32xf32, #tpu.memory_space<vmem>>, %arg3: memref<32x16xf32, #tpu.memory_space<vmem>>, %arg4: memref<8x16xf32, #tpu.memory_space<vmem>>) attributes {dimension_semantics = [#tpu.dimension_semantics<parallel>, #tpu.dimension_semantics<parallel>], iteration_bounds = array<i64: 1, 1>, scalar_prefetch = 0 : i64, scratch_operands = 0 : i64, tpu.core_type = #tpu.core_type<tc>, window_params = [{transform_indices = @transform_0, window_bounds = array<i64: 8, 32>}, {transform_indices = @transform_1, window_bounds = array<i64: 32, 16>}, {transform_indices = @transform_2, window_bounds = array<i64: 8, 16>}]} {
    %c0 = arith.constant 0 : index
    %c0_0 = arith.constant 0 : index
    %0 = vector.load %arg2[%c0, %c0_0] : memref<8x32xf32, #tpu.memory_space<vmem>>, vector<8x32xf32>
    %c0_1 = arith.constant 0 : index
    %c0_2 = arith.constant 0 : index
    %1 = vector.load %arg3[%c0_1, %c0_2] : memref<32x16xf32, #tpu.memory_space<vmem>>, vector<32x16xf32>
    %cst = arith.constant dense<0.000000e+00> : vector<8x16xf32>
    %2 = tpu.matmul %0, %1, %cst {dimension_numbers = #tpu.dot_dimension_numbers<[1], [0], [0], [1], [0, 0, 1, 1], [], []>} : vector<8x32xf32>, vector<32x16xf32>, vector<8x16xf32> -> vector<8x16xf32>
    %c0_3 = arith.constant 0 : index
    %c0_4 = arith.constant 0 : index
    %3 = vector.load %arg4[%c0_3, %c0_4] : memref<8x16xf32, #tpu.memory_space<vmem>>, vector<8x16xf32>
    tpu.vector_store %arg4[%c0_3, %c0_4], %2 {strides = array<i32>} : memref<8x16xf32, #tpu.memory_space<vmem>>, vector<8x16xf32>,
    return
  }
  func.func @transform_0(%arg0: i32, %arg1: i32) -> (i32, i32) {
    %c0_i32 = arith.constant 0 : i32
    %c0_i32_0 = arith.constant 0 : i32
    return %arg0, %c0_i32 : i32, i32
  }
  func.func @transform_1(%arg0: i32, %arg1: i32) -> (i32, i32) {
    %c0_i32 = arith.constant 0 : i32
    %c0_i32_0 = arith.constant 0 : i32
    return %c0_i32, %arg1 : i32, i32
  }
  func.func @transform_2(%arg0: i32, %arg1: i32) -> (i32, i32) {
    %c0_i32 = arith.constant 0 : i32
    return %arg0, %arg1 : i32, i32
  }
}

</mosaic_0001>

<bundles_post_ra>
// kernel: prototype_matrix_forward.1
= control target key start
LH: loop header
LB: loop body
LE: loop exit
PB: predicated region body
PF: predicated region fallthrough
CT: control target
= control target key end

     0   :  { %v158_v3 = vmov 0.0|0.0   ;;  %vm159_vm0 = vmmov 0   ;;  %v160_v6 = vmov 0.0   ;;  %s204_s0 = inlined_call_operand.vmem [shape: f32[8,32], index: 0, kind: input, shape index: {}]   ;;  %s205_s1 = inlined_call_operand.vmem [shape: f32[32,16], index: 1, kind: input, shape index: {}]   ;;  %s206_s2 = inlined_call_operand.hbm [shape: f32[8,16], index: 2, kind: output, shape index: {}]  }
   0x1   :  { %v13_v0 = vld [vmem:[%s205_s1] sm:$0xff]  ;;  %v14_v1 = vld [vmem:[%s205_s1 + $0x8] sm:$0xff]  ;;  %v15_v2 = vld [vmem:[%s205_s1 + $0x10] sm:$0xff]  ;;  %124 = vmatprep.subr.bf16.mxu0 %v158_v3  ;;  %121 = vmatprep.mubr.msk.f32.mxu0 %vm159_vm0, %v160_v6 }
   0x2   :  { %v125_v4 = vpack.c.bf16 %v14_v1, %v13_v0  ;;  %v16_v5 = vld [vmem:[%s205_s1 + $0x18] sm:$0xff] }
   0x3   :  { %7 = vsyncpa [#allocation3], 0  ;;  %v128_v7 = vpack.c.bf16 %v16_v5, %v15_v2  ;;  %v12_v8 = vld [vmem:[%s204_s0] sm:$0xff]  ;;  %vm17_vm1 = vcmask 261120   ;;  %s161_s19 = smov [#allocation2]   ;;  %vm91_vm2 = vcmask 130048  }
   0x4   :  { %126 = vmatpush3.bf16.msra.mxu0 %v125_v4  ;;  %s99_s20 = sshll.u32 %s161_s19, 4  ;;  %s100_s20 = int_to_ptr.vmem [resolvable:$true] %s99_s20 }
   0x5   :  { %127 = vmatprep.subr.bf16.mxu0 %v158_v3  ;;  %s134_s1 = scalar_lea.vmem %s100_s20, 128  ;;  %p139_p1 = scmp.lt.s32.totalorder %s100_s20, %s100_s20 }
   0x6   :  { %p135_p0 = scmp.ne.s32.totalorder %s100_s20, %s134_s1  ;;  %p140_p2 = scmp.lt.s32.totalorder %s134_s1, %s134_s1 }
   0x8   :  { %129 = vmatpush3.bf16.msra.mxu0 %v128_v7  ;;  %p141_p3 = por %p140_p2, %p139_p1 }
   0xa   :  { %p142_p4 = pnand %p141_p3, %p135_p0 }
   0xb   :  { %122 = vmatmul.mubr.msk.f32.vlgmr.msra.gmra.mrb[0].mxu0 %vm17_vm1, %v12_v8 }
  0xde   :  { %v87_v9 = vpop.f32.mrb[0].mxu0 }
  0xdf   :  { %92 = vst.msk [vmem:[#allocation2] sm:$0xff] %vm91_vm2, %v87_v9  ;;  %v123_v10 = vpop.f32.mrb[1].mxu0 }
  0xe0   :  { %145 = shalt.err (!%p142_p4)
}
  0xe1   :  { %s146_s0 = scalar_lea.hbm %s206_s2, 128 }
  0xe2   :  { %p147_p5 = scmp.ne.s32.totalorder %s206_s2, %s146_s0  ;;  %p150_p6 = scmp.lt.u32.totalorder %s146_s0, %s206_s2 }
  0xe4   :  { %p152_p7 = pnand %p150_p6, %p147_p5 }
  0xe6   :  { %155 = shalt.err (!%p152_p7)
}
  0xe7   :  { %102 = dma.vmem_to_hbm [thread:$0]  %s100_s20, 128, %s206_s2, [#allocation3]  }
  0xe8   :  { %156 = dma.done.wait [#allocation3], 128  }
  0xe9   :  { %157 = vsyncadd [#allocation3], 4294967168 }
  0xea   :  { %106 = vsyncpa [#allocation3], 1 }

</bundles_post_ra>
